<compile_context>
chip_gen: v7x
topology: tpu7x:2x2x1
jax: 0.10.0
libtpu: 0.0.40
codegen_flags: <defaults>
</compile_context>

<pallas_src>
import functools

import jax
import jax.numpy as jnp
from jax import lax
from jax.experimental import pallas as pl
from jax.experimental.pallas import tpu as pltpu


def _round_up(x, m):
    return ((x + m - 1) // m) * m


def msgc_kernel(x_ref, wc_ref, bc_ref, w4_ref, b4_ref, Aaug_ref,
                out_ref, y_scr, *, bn, V, R, CT, WT):
    # One MXU call produces conv3 (Kron I_T layout) AND the mean-fused
    # conv1/conv2 columns for every batch element of this block.
    y_scr[...] = (jnp.dot(x_ref[...], wc_ref[...],
                          preferred_element_type=jnp.float32)
                  + bc_ref[...])

    Aaug = Aaug_ref[...]          # (Ap, V): rows [A ; ones ; zero-pad]
    w4b = w4_ref[...]             # (R*V, CT)  alpha*w4, pre-broadcast over u
    b4b = b4_ref[...]             # (V, CT)    alpha*b4, pre-broadcast over u
    RV = R * V

    def body(b, carry):
        r0 = pl.multiple_of(b * V, V)
        y3b = y_scr[pl.ds(r0, V), pl.ds(0, CT)]          # (V, CT), rows = v
        x12 = y_scr[pl.ds(r0, V), pl.ds(CT, WT)]         # (V, WT); cols 0..2R-1 real
        x1b = x12[:, :R]                                 # (V, R)   conv1 mean, u rows
        x2t = x12[:, R:2 * R].T                          # (R, V)   conv2 mean, v lanes
        parts = [jnp.tanh(x1b[:, r:r + 1] - x2t[r:r + 1, :]) for r in range(R)]
        # [tanh blocks ; A ; ones ; 0-pad] -> one small MXU call gives conv4's
        # contraction, the A term, and sum_v y3 (for the bias) together.
        da = jnp.concatenate(parts + [Aaug], axis=0)     # (R*V + Ap, V)
        pq = jnp.dot(da, y3b, preferred_element_type=jnp.float32)

        acc = pq[RV:RV + V, :] + b4b * pq[RV + V:RV + V + 1, :]
        wp = w4b * pq[:RV, :]                            # (R*V, CT) scaled tanh terms
        for r in range(R):
            acc = acc + wp[r * V:(r + 1) * V, :]

        out_ref[pl.ds(r0, V), :] = acc.astype(out_ref.dtype)
        return carry

    lax.fori_loop(0, bn, body, 0, unroll=bn <= 4)


def _pick_block_batch(N, V, cin_t, cout_t, wt, vmem_budget_bytes=20 << 20):
    """Batch elements per grid step, derived from a VMEM byte budget.

    Per-row cost (f32): xT block x2 buffers + out block x2 buffers + scratch.
    ~20 MiB of blocks fits every generation once the scoped limit is 32 MiB
    (v7x has 64 MiB physical).  bn is maximized; >= 2 grid steps are only
    kept when each step still has >= 512 rows (only pays off on v7x's 2 TCs)."""
    bytes_per_row = 4 * (2 * cin_t + 2 * cout_t + (cout_t + wt))
    max_rows = max(V, vmem_budget_bytes // bytes_per_row)
    cap = max(1, min(N, max_rows // V))
    cand = [bn for bn in range(1, cap + 1)
            if N % bn == 0 and ((bn * V) % 8 == 0 or bn == N)]
    if not cand:
        return N
    best = max(cand)
    multi = [bn for bn in cand if N // bn >= 2 and bn * V >= 512]
    return max(multi) if multi else best


def msgc_forward(x, params, A, alpha=1.0, block_batch=None):
    """x: (N, Cin, T, V) float32, A: (V, V) float32 -> (N, Cout, T, V)."""
    w1, b1, w2, b2, w3, b3, w4, b4 = params
    N, Cin, T, V = x.shape
    R = w1.shape[0]
    Cout = w3.shape[0]
    CinT, CT = Cin * T, Cout * T
    WT = max(128, _round_up(2 * R, 128))          # lane-group tail for x1/x2 cols

    bn = (_pick_block_batch(N, V, CinT, CT, WT) if block_batch is None
          else block_batch)
    assert N % bn == 0

    f32 = jnp.float32
    x = x.astype(f32)

    # Lane-dense transposed input: xT[n*V + v, c*T + t] = x[n, c, t, v].
    xT = jnp.transpose(x, (0, 3, 1, 2)).reshape(N * V, CinT)

    # conv3 as Kron(w3, I_T): w3k[c*T + t', o*T + t] = w3[o, c] * (t' == t).
    w3k = (w3.T[:, None, :, None].astype(f32)
           * jnp.eye(T, dtype=f32)[None, :, None, :]).reshape(CinT, CT)
    b3l = jnp.repeat(b3.astype(f32), T).reshape(1, CT)

    # conv1 & conv2 stacked, fused with the temporal mean, padded to one
    # lane group and glued onto w3k so ONE MXU call yields both results.
    w12 = jnp.concatenate([w1, w2], axis=0).astype(f32)           # (2R, Cin)
    w12m = jnp.repeat(w12.T / T, T, axis=0)                       # (CinT, 2R)
    w12m = jnp.pad(w12m, ((0, 0), (0, WT - 2 * R)))
    b12 = jnp.pad(jnp.concatenate([b1, b2]).astype(f32),
                  (0, WT - 2 * R)).reshape(1, WT)
    wcomb = jnp.concatenate([w3k, w12m], axis=1)                  # (CinT, CT+WT)
    bcomb = jnp.concatenate([b3l, b12], axis=1)                   # (1, CT+WT)

    # conv4 weights: alpha folded in, expanded along the (o*T + t) lane dim,
    # and pre-broadcast over the V sublanes (no broadcasts inside the kernel).
    alpha = f32(alpha)
    w4l = alpha * jnp.repeat(w4.T.astype(f32), T, axis=1)         # (R, CT)
    b4l = alpha * jnp.repeat(b4.astype(f32), T).reshape(1, CT)
    w4big = jnp.repeat(w4l, V, axis=0)                            # (R*V, CT)
    b4big = jnp.tile(b4l, (V, 1))                                 # (V, CT)

    # [A ; ones ; zero-pad] pre-stacked (rows padded to a multiple of 8).
    Ap = _round_up(V + 1, 8)
    Aaug = jnp.zeros((Ap, V), f32)
    Aaug = Aaug.at[:V, :].set(A.astype(f32))
    Aaug = Aaug.at[V, :].set(1.0)

    kernel = functools.partial(msgc_kernel, bn=bn, V=V, R=R, CT=CT, WT=WT)

    def const_spec(shape):
        # Grid-invariant operand: constant index_map -> single resident copy.
        return pl.BlockSpec(shape, lambda i: tuple(0 for _ in shape))

    out2 = pl.pallas_call(
        kernel,
        out_shape=jax.ShapeDtypeStruct((N * V, CT), f32),
        grid_spec=pltpu.PrefetchScalarGridSpec(
            num_scalar_prefetch=0,
            grid=(N // bn,),
            in_specs=[
                pl.BlockSpec((bn * V, CinT), lambda i: (i, 0)),   # xT
                const_spec((CinT, CT + WT)),                      # [w3 Kron I_T | w12/T]
                const_spec((1, CT + WT)),                         # [b3 | b12]
                const_spec((R * V, CT)),                          # alpha*w4 (broadcast)
                const_spec((V, CT)),                              # alpha*b4 (broadcast)
                const_spec((Ap, V)),                              # [A ; ones ; 0]
            ],
            out_specs=pl.BlockSpec((bn * V, CT), lambda i: (i, 0)),
            scratch_shapes=[pltpu.VMEM((bn * V, CT + WT), f32)],
        ),
        compiler_params=pltpu.CompilerParams(
            dimension_semantics=("parallel",),
            vmem_limit_bytes=32 * 1024 * 1024),
    )(xT, wcomb, bcomb, w4big, b4big, Aaug)

    # out2[n*V + u, o*T + t] = out[n, o, t, u]  ->  NCHW layout (free in XLA).
    return jnp.transpose(out2.reshape(N, V, Cout, T), (0, 2, 3, 1))


def init_msgc_params(key, in_channels, out_channels, rel_reduction=8):
    """Deterministic re-implementation of the module's __init__ (1x1 convs).

    kaiming_normal_(mode='fan_out') for a 1x1 conv -> std = sqrt(2 / out_c);
    biases are zero-initialized (conv_init)."""
    if in_channels in (3, 9):
        rel_channels = 8
    else:
        rel_channels = in_channels // rel_reduction
    k1, k2, k3, k4 = jax.random.split(key, 4)

    def kaiming(k, out_c, in_c):
        std = (2.0 / out_c) ** 0.5
        return std * jax.random.normal(k, (out_c, in_c), dtype=jnp.float32)

    w1 = kaiming(k1, rel_channels, in_channels)
    b1 = jnp.zeros((rel_channels,), jnp.float32)
    w2 = kaiming(k2, rel_channels, in_channels)
    b2 = jnp.zeros((rel_channels,), jnp.float32)
    w3 = kaiming(k3, out_channels, in_channels)
    b3 = jnp.zeros((out_channels,), jnp.float32)
    w4 = kaiming(k4, out_channels, rel_channels)
    b4 = jnp.zeros((out_channels,), jnp.float32)
    return (w1, b1, w2, b2, w3, b3, w4, b4)


def msgc_reference(x, params, A, alpha=1.0):
    """Pure-JAX reference mirroring the torch forward exactly."""
    w1, b1, w2, b2, w3, b3, w4, b4 = params

    def conv1x1(x_, w, b):  # x_: (N, C, T, V)
        return jnp.einsum('oc,nctv->notv', w, x_) + b[None, :, None, None]

    x1 = conv1x1(x, w1, b1).mean(-2)         # (N, R, V)
    x2 = conv1x1(x, w2, b2).mean(-2)         # (N, R, V)
    x3 = conv1x1(x, w3, b3)                  # (N, Cout, T, V)
    d = jnp.tanh(x1[..., :, None] - x2[..., None, :])          # (N, R, V, V)
    a = jnp.einsum('or,nruv->nouv', w4, d) + b4[None, :, None, None]
    a = a * alpha + A[None, None, :, :]
    return jnp.einsum('ncuv,nctv->nctu', a, x3)


if __name__ == "__main__":
    N, Cin, Cout, T, V = 2, 16, 32, 8, 16
    alpha = 0.5

    key = jax.random.PRNGKey(0)
    kx, kA, kp = jax.random.split(key, 3)

    x = jax.random.normal(kx, (N, Cin, T, V), dtype=jnp.float32)
    A = jax.random.normal(kA, (V, V), dtype=jnp.float32)
    params = init_msgc_params(kp, Cin, Cout)

    out = jax.block_until_ready(msgc_forward(x, params, A, alpha=alpha))
    ref = jax.block_until_ready(msgc_reference(x, params, A, alpha=alpha))

    assert out.shape == (N, Cout, T, V), out.shape
    max_err = float(jnp.max(jnp.abs(out - ref)))
    assert jnp.allclose(out, ref, rtol=2e-3, atol=2e-3), max_err

    print("KERNEL_OK")
</pallas_src>

<mosaic_0001>
module attributes {stable_mosaic.version = 11 : i64} {
  func.func @msgc_kernel(%arg0: i32, %arg1: memref<32x128xf32, #tpu.memory_space<vmem>>, %arg2: memref<128x384xf32, #tpu.memory_space<vmem>>, %arg3: memref<1x384xf32, #tpu.memory_space<vmem>>, %arg4: memref<32x256xf32, #tpu.memory_space<vmem>>, %arg5: memref<16x256xf32, #tpu.memory_space<vmem>>, %arg6: memref<24x16xf32, #tpu.memory_space<vmem>>, %arg7: memref<32x256xf32, #tpu.memory_space<vmem>>, %arg8: memref<32x384xf32, #tpu.memory_space<vmem>>) attributes {dimension_semantics = [#tpu.dimension_semantics<parallel>], iteration_bounds = array<i64: 1>, scalar_prefetch = 0 : i64, scratch_operands = 1 : i64, tpu.core_type = #tpu.core_type<tc>, window_params = [{transform_indices = @transform_0, window_bounds = array<i64: 32, 128>}, {pipeline_mode = #tpu.pipeline_mode<synchronous>, transform_indices = @transform_1, window_bounds = array<i64: 128, 384>}, {pipeline_mode = #tpu.pipeline_mode<synchronous>, transform_indices = @transform_2, window_bounds = array<i64: 1, 384>}, {pipeline_mode = #tpu.pipeline_mode<synchronous>, transform_indices = @transform_3, window_bounds = array<i64: 32, 256>}, {pipeline_mode = #tpu.pipeline_mode<synchronous>, transform_indices = @transform_4, window_bounds = array<i64: 16, 256>}, {pipeline_mode = #tpu.pipeline_mode<synchronous>, transform_indices = @transform_5, window_bounds = array<i64: 24, 16>}, {transform_indices = @transform_6, window_bounds = array<i64: 32, 256>}]} {
    %c0 = arith.constant 0 : index
    %c0_0 = arith.constant 0 : index
    %0 = vector.load %arg1[%c0, %c0_0] : memref<32x128xf32, #tpu.memory_space<vmem>>, vector<32x128xf32>
    %c0_1 = arith.constant 0 : index
    %c0_2 = arith.constant 0 : index
    %1 = vector.load %arg2[%c0_1, %c0_2] : memref<128x384xf32, #tpu.memory_space<vmem>>, vector<128x384xf32>
    %cst = arith.constant dense<0.000000e+00> : vector<32x384xf32>
    %2 = tpu.matmul %0, %1, %cst {dimension_numbers = #tpu.dot_dimension_numbers<[1], [0], [0], [1], [0, 0, 1, 1], [], []>} : vector<32x128xf32>, vector<128x384xf32>, vector<32x384xf32> -> vector<32x384xf32>
    %c0_3 = arith.constant 0 : index
    %c0_4 = arith.constant 0 : index
    %3 = vector.load %arg3[%c0_3, %c0_4] : memref<1x384xf32, #tpu.memory_space<vmem>>, vector<1x384xf32>
    %4 = vector.broadcast %3 : vector<1x384xf32> to vector<32x384xf32>
    %5 = arith.addf %2, %4 : vector<32x384xf32>
    %c0_5 = arith.constant 0 : index
    %c0_6 = arith.constant 0 : index
    %6 = vector.load %arg8[%c0_5, %c0_6] : memref<32x384xf32, #tpu.memory_space<vmem>>, vector<32x384xf32>
    tpu.vector_store %arg8[%c0_5, %c0_6], %5 {strides = array<i32>} : memref<32x384xf32, #tpu.memory_space<vmem>>, vector<32x384xf32>,
    %c0_7 = arith.constant 0 : index
    %c0_8 = arith.constant 0 : index
    %7 = vector.load %arg6[%c0_7, %c0_8] : memref<24x16xf32, #tpu.memory_space<vmem>>, vector<24x16xf32>
    %c0_9 = arith.constant 0 : index
    %c0_10 = arith.constant 0 : index
    %8 = vector.load %arg4[%c0_9, %c0_10] : memref<32x256xf32, #tpu.memory_space<vmem>>, vector<32x256xf32>
    %c0_11 = arith.constant 0 : index
    %c0_12 = arith.constant 0 : index
    %9 = vector.load %arg5[%c0_11, %c0_12] : memref<16x256xf32, #tpu.memory_space<vmem>>, vector<16x256xf32>
    %c0_i32 = arith.constant 0 : i32
    %c16_i32 = arith.constant 16 : i32
    %10 = arith.muli %c0_i32, %c16_i32 : i32
    %11 = tpu.assume_multiple %10, 16 : i32
    %12 = arith.index_cast %11 : i32 to index
    %c0_13 = arith.constant 0 : index
    %13 = vector.load %arg8[%12, %c0_13] : memref<32x384xf32, #tpu.memory_space<vmem>>, vector<16x256xf32>
    %14 = arith.index_cast %11 : i32 to index
    %c256 = arith.constant 256 : index
    %15 = vector.load %arg8[%14, %c256] : memref<32x384xf32, #tpu.memory_space<vmem>>, vector<16x128xf32>
    %16 = vector.extract_strided_slice %15 {offsets = [0, 0], sizes = [16, 2], strides = [1, 1]} : vector<16x128xf32> to vector<16x2xf32>
    %17 = vector.extract_strided_slice %15 {offsets = [0, 2], sizes = [16, 2], strides = [1, 1]} : vector<16x128xf32> to vector<16x2xf32>
    %18 = tpu.transpose %17, [1, 0] : vector<16x2xf32> -> vector<2x16xf32>
    %19 = vector.extract_strided_slice %16 {offsets = [0, 0], sizes = [16, 1], strides = [1, 1]} : vector<16x2xf32> to vector<16x1xf32>
    %20 = vector.extract_strided_slice %18 {offsets = [0, 0], sizes = [1, 16], strides = [1, 1]} : vector<2x16xf32> to vector<1x16xf32>
    %21 = vector.broadcast %19 : vector<16x1xf32> to vector<16x16xf32>
    %22 = vector.broadcast %20 : vector<1x16xf32> to vector<16x16xf32>
    %23 = arith.subf %21, %22 : vector<16x16xf32>
    %24 = math.tanh %23 : vector<16x16xf32>
    %25 = vector.extract_strided_slice %16 {offsets = [0, 1], sizes = [16, 1], strides = [1, 1]} : vector<16x2xf32> to vector<16x1xf32>
    %26 = vector.extract_strided_slice %18 {offsets = [1, 0], sizes = [1, 16], strides = [1, 1]} : vector<2x16xf32> to vector<1x16xf32>
    %27 = vector.broadcast %25 : vector<16x1xf32> to vector<16x16xf32>
    %28 = vector.broadcast %26 : vector<1x16xf32> to vector<16x16xf32>
    %29 = arith.subf %27, %28 : vector<16x16xf32>
    %30 = math.tanh %29 : vector<16x16xf32>
    %31 = tpu.concatenate %24, %30, %7 in 0 : vector<16x16xf32>, vector<16x16xf32>, vector<24x16xf32> -> vector<56x16xf32>
    %cst_14 = arith.constant dense<0.000000e+00> : vector<56x256xf32>
    %32 = tpu.matmul %31, %13, %cst_14 {dimension_numbers = #tpu.dot_dimension_numbers<[1], [0], [0], [1], [0, 0, 1, 1], [], []>} : vector<56x16xf32>, vector<16x256xf32>, vector<56x256xf32> -> vector<56x256xf32>
    %33 = vector.extract_strided_slice %32 {offsets = [32, 0], sizes = [16, 256], strides = [1, 1]} : vector<56x256xf32> to vector<16x256xf32>
    %34 = vector.extract_strided_slice %32 {offsets = [48, 0], sizes = [1, 256], strides = [1, 1]} : vector<56x256xf32> to vector<1x256xf32>
    %35 = vector.broadcast %34 : vector<1x256xf32> to vector<16x256xf32>
    %36 = arith.mulf %9, %35 : vector<16x256xf32>
    %37 = arith.addf %33, %36 : vector<16x256xf32>
    %38 = vector.extract_strided_slice %32 {offsets = [0, 0], sizes = [32, 256], strides = [1, 1]} : vector<56x256xf32> to vector<32x256xf32>
    %39 = arith.mulf %8, %38 : vector<32x256xf32>
    %40 = vector.extract_strided_slice %39 {offsets = [0, 0], sizes = [16, 256], strides = [1, 1]} : vector<32x256xf32> to vector<16x256xf32>
    %41 = arith.addf %37, %40 : vector<16x256xf32>
    %42 = vector.extract_strided_slice %39 {offsets = [16, 0], sizes = [16, 256], strides = [1, 1]} : vector<32x256xf32> to vector<16x256xf32>
    %43 = arith.addf %41, %42 : vector<16x256xf32>
    %44 = arith.index_cast %11 : i32 to index
    %c0_15 = arith.constant 0 : index
    %45 = vector.load %arg7[%44, %c0_15] : memref<32x256xf32, #tpu.memory_space<vmem>>, vector<16x256xf32>
    tpu.vector_store %arg7[%44, %c0_15], %43 {strides = array<i32>} : memref<32x256xf32, #tpu.memory_space<vmem>>, vector<16x256xf32>,
    %c1_i32 = arith.constant 1 : i32
    %c16_i32_16 = arith.constant 16 : i32
    %46 = arith.muli %c1_i32, %c16_i32_16 : i32
    %47 = tpu.assume_multiple %46, 16 : i32
    %48 = arith.index_cast %47 : i32 to index
    %c0_17 = arith.constant 0 : index
    %49 = vector.load %arg8[%48, %c0_17] : memref<32x384xf32, #tpu.memory_space<vmem>>, vector<16x256xf32>
    %50 = arith.index_cast %47 : i32 to index
    %c256_18 = arith.constant 256 : index
    %51 = vector.load %arg8[%50, %c256_18] : memref<32x384xf32, #tpu.memory_space<vmem>>, vector<16x128xf32>
    %52 = vector.extract_strided_slice %51 {offsets = [0, 0], sizes = [16, 2], strides = [1, 1]} : vector<16x128xf32> to vector<16x2xf32>
    %53 = vector.extract_strided_slice %51 {offsets = [0, 2], sizes = [16, 2], strides = [1, 1]} : vector<16x128xf32> to vector<16x2xf32>
    %54 = tpu.transpose %53, [1, 0] : vector<16x2xf32> -> vector<2x16xf32>
    %55 = vector.extract_strided_slice %52 {offsets = [0, 0], sizes = [16, 1], strides = [1, 1]} : vector<16x2xf32> to vector<16x1xf32>
    %56 = vector.extract_strided_slice %54 {offsets = [0, 0], sizes = [1, 16], strides = [1, 1]} : vector<2x16xf32> to vector<1x16xf32>
    %57 = vector.broadcast %55 : vector<16x1xf32> to vector<16x16xf32>
    %58 = vector.broadcast %56 : vector<1x16xf32> to vector<16x16xf32>
    %59 = arith.subf %57, %58 : vector<16x16xf32>
    %60 = math.tanh %59 : vector<16x16xf32>
    %61 = vector.extract_strided_slice %52 {offsets = [0, 1], sizes = [16, 1], strides = [1, 1]} : vector<16x2xf32> to vector<16x1xf32>
    %62 = vector.extract_strided_slice %54 {offsets = [1, 0], sizes = [1, 16], strides = [1, 1]} : vector<2x16xf32> to vector<1x16xf32>
    %63 = vector.broadcast %61 : vector<16x1xf32> to vector<16x16xf32>
    %64 = vector.broadcast %62 : vector<1x16xf32> to vector<16x16xf32>
    %65 = arith.subf %63, %64 : vector<16x16xf32>
    %66 = math.tanh %65 : vector<16x16xf32>
    %67 = tpu.concatenate %60, %66, %7 in 0 : vector<16x16xf32>, vector<16x16xf32>, vector<24x16xf32> -> vector<56x16xf32>
    %cst_19 = arith.constant dense<0.000000e+00> : vector<56x256xf32>
    %68 = tpu.matmul %67, %49, %cst_19 {dimension_numbers = #tpu.dot_dimension_numbers<[1], [0], [0], [1], [0, 0, 1, 1], [], []>} : vector<56x16xf32>, vector<16x256xf32>, vector<56x256xf32> -> vector<56x256xf32>
    %69 = vector.extract_strided_slice %68 {offsets = [32, 0], sizes = [16, 256], strides = [1, 1]} : vector<56x256xf32> to vector<16x256xf32>
    %70 = vector.extract_strided_slice %68 {offsets = [48, 0], sizes = [1, 256], strides = [1, 1]} : vector<56x256xf32> to vector<1x256xf32>
    %71 = vector.broadcast %70 : vector<1x256xf32> to vector<16x256xf32>
    %72 = arith.mulf %9, %71 : vector<16x256xf32>
    %73 = arith.addf %69, %72 : vector<16x256xf32>
    %74 = vector.extract_strided_slice %68 {offsets = [0, 0], sizes = [32, 256], strides = [1, 1]} : vector<56x256xf32> to vector<32x256xf32>
    %75 = arith.mulf %8, %74 : vector<32x256xf32>
    %76 = vector.extract_strided_slice %75 {offsets = [0, 0], sizes = [16, 256], strides = [1, 1]} : vector<32x256xf32> to vector<16x256xf32>
    %77 = arith.addf %73, %76 : vector<16x256xf32>
    %78 = vector.extract_strided_slice %75 {offsets = [16, 0], sizes = [16, 256], strides = [1, 1]} : vector<32x256xf32> to vector<16x256xf32>
    %79 = arith.addf %77, %78 : vector<16x256xf32>
    %80 = arith.index_cast %47 : i32 to index
    %c0_20 = arith.constant 0 : index
    %81 = vector.load %arg7[%80, %c0_20] : memref<32x256xf32, #tpu.memory_space<vmem>>, vector<16x256xf32>
    tpu.vector_store %arg7[%80, %c0_20], %79 {strides = array<i32>} : memref<32x256xf32, #tpu.memory_space<vmem>>, vector<16x256xf32>,
    %c2_i32 = arith.constant 2 : i32
    return
  }
  func.func @transform_0(%arg0: i32) -> (i32, i32) {
    %c0_i32 = arith.constant 0 : i32
    %c0_i32_0 = arith.constant 0 : i32
    return %arg0, %c0_i32 : i32, i32
  }
  func.func @transform_1(%arg0: i32) -> (i32, i32) {
    %c0_i32 = arith.constant 0 : i32
    %c0_i32_0 = arith.constant 0 : i32
    %c0_i32_1 = arith.constant 0 : i32
    return %c0_i32, %c0_i32_0 : i32, i32
  }
  func.func @transform_2(%arg0: i32) -> (i32, i32) {
    %c0_i32 = arith.constant 0 : i32
    %c0_i32_0 = arith.constant 0 : i32
    %c0_i32_1 = arith.constant 0 : i32
    return %c0_i32, %c0_i32_0 : i32, i32
  }
  func.func @transform_3(%arg0: i32) -> (i32, i32) {
    %c0_i32 = arith.constant 0 : i32
    %c0_i32_0 = arith.constant 0 : i32
    %c0_i32_1 = arith.constant 0 : i32
    return %c0_i32, %c0_i32_0 : i32, i32
  }
  func.func @transform_4(%arg0: i32) -> (i32, i32) {
    %c0_i32 = arith.constant 0 : i32
    %c0_i32_0 = arith.constant 0 : i32
    %c0_i32_1 = arith.constant 0 : i32
    return %c0_i32, %c0_i32_0 : i32, i32
  }
  func.func @transform_5(%arg0: i32) -> (i32, i32) {
    %c0_i32 = arith.constant 0 : i32
    %c0_i32_0 = arith.constant 0 : i32
    %c0_i32_1 = arith.constant 0 : i32
    return %c0_i32, %c0_i32_0 : i32, i32
  }
  func.func @transform_6(%arg0: i32) -> (i32, i32) {
    %c0_i32 = arith.constant 0 : i32
    %c0_i32_0 = arith.constant 0 : i32
    return %arg0, %c0_i32 : i32, i32
  }
}

</mosaic_0001>

<bundles_post_ra>
// kernel: tpu_custom_call.1
= control target key start
LH: loop header
LB: loop body
LE: loop exit
PB: predicated region body
PF: predicated region fallthrough
CT: control target
= control target key end

     0   :  { %11 = vsyncpa [#allocation4], 0  ;;  %s1321_s0 = inlined_call_operand.vmem [shape: f32[32,128], index: 0, kind: input, shape index: {}]   ;;  %s1322_s1 = inlined_call_operand.hbm [shape: f32[128,384], index: 1, kind: input, shape index: {}]   ;;  %s1323_s2 = inlined_call_operand.vmem [shape: f32[1,384], index: 2, kind: input, shape index: {}]   ;;  %s1324_s3 = inlined_call_operand.hbm [shape: f32[32,256], index: 3, kind: input, shape index: {}]   ;;  %s1325_s4 = inlined_call_operand.hbm [shape: f32[16,256], index: 4, kind: input, shape index: {}]   ;;  %s1326_s5 = inlined_call_operand.vmem [shape: f32[24,16], index: 5, kind: input, shape index: {}]   ;;  %s1327_s6 = inlined_call_operand.hbm [shape: f32[32,256], index: 6, kind: output, shape index: {}]  }
   0x1   :  { %12 = vsyncpa [#allocation7], 0 }
   0x2   :  { %13 = vsyncpa [#allocation5], 0  ;;  %s1118_s21 = smov [#allocation6]   ;;  %s1024_s25 = scalar_lea.hbm %s1324_s3, 1024 }
   0x3   :  { %s35_s22 = sshll.u32 %s1118_s21, 4  ;;  %p1025_p0 = scmp.ne.s32.totalorder %s1324_s3, %s1024_s25  ;;  %s36_s22 = int_to_ptr.vmem [resolvable:$true] %s35_s22 }
   0x4   :  { %p1028_p1 = scmp.lt.u32.totalorder %s1024_s25, %s1324_s3 }
   0x6   :  { %p1030_p2 = pnand %p1028_p1, %p1025_p0 }
   0x8   :  { %1033 = shalt.err (!%p1030_p2)
}
   0x9   :  { %s1034_s30 = scalar_lea.vmem %s36_s22, 1024  ;;  %p1039_p4 = scmp.lt.s32.totalorder %s36_s22, %s36_s22 }
   0xa   :  { %p1035_p3 = scmp.ne.s32.totalorder %s36_s22, %s1034_s30  ;;  %p1040_p5 = scmp.lt.s32.totalorder %s1034_s30, %s1034_s30 }
   0xc   :  { %p1041_p6 = por %p1040_p5, %p1039_p4 }
   0xe   :  { %p1042_p7 = pnand %p1041_p6, %p1035_p3 }
  0x10   :  { %1045 = shalt.err (!%p1042_p7)
}
  0x11   :  { %s1119_s7 = smov 256   ;;  %s1120_s8 = smov 16  }
  0x12   :  { %41 = dma.hbm_to_vmem [thread:$0]  %s1324_s3, 1024, %s36_s22, [#allocation7], %s1119_s7, %s1119_s7, %s1120_s8  }
  0x13   :  { %s1121_s11 = smov [#allocation3]   ;;  %s1046_s15 = scalar_lea.hbm %s1322_s1, 6144 }
  0x14   :  { %s21_s12 = sshll.u32 %s1121_s11, 4  ;;  %p1047_p8 = scmp.ne.s32.totalorder %s1322_s1, %s1046_s15  ;;  %s22_s12 = int_to_ptr.vmem [resolvable:$true] %s21_s12 }
  0x15   :  { %p1050_p9 = scmp.lt.u32.totalorder %s1046_s15, %s1322_s1 }
  0x17   :  { %p1052_p10 = pnand %p1050_p9, %p1047_p8 }
  0x19   :  { %1055 = shalt.err (!%p1052_p10)
}
  0x1a   :  { %s1056_s20 = scalar_lea.vmem %s22_s12, 6144  ;;  %p1061_p12 = scmp.lt.s32.totalorder %s22_s12, %s22_s12 }
  0x1b   :  { %p1057_p11 = scmp.ne.s32.totalorder %s22_s12, %s1056_s20  ;;  %p1062_p13 = scmp.lt.s32.totalorder %s1056_s20, %s1056_s20 }
  0x1d   :  { %p1063_p0 = por %p1062_p13, %p1061_p12 }
  0x1f   :  { %p1064_p1 = pnand %p1063_p0, %p1057_p11 }
  0x21   :  { %1067 = shalt.err (!%p1064_p1)
}
  0x22   :  { %s1122_s3 = smov 384   ;;  %s1123_s21 = smov 24  }
  0x23   :  { %27 = dma.hbm_to_vmem [thread:$0]  %s1322_s1, 6144, %s22_s12, [#allocation4], %s1122_s3, %s1122_s3, %s1123_s21  }
  0x24   :  { %s1124_s24 = smov [#allocation8]   ;;  %s1068_s28 = scalar_lea.hbm %s1325_s4, 512 }
  0x25   :  { %s47_s25 = sshll.u32 %s1124_s24, 4  ;;  %p1069_p2 = scmp.ne.s32.totalorder %s1325_s4, %s1068_s28  ;;  %s48_s25 = int_to_ptr.vmem [resolvable:$true] %s47_s25 }
  0x26   :  { %p1072_p3 = scmp.lt.u32.totalorder %s1068_s28, %s1325_s4 }
  0x28   :  { %p1074_p4 = pnand %p1072_p3, %p1069_p2 }
  0x2a   :  { %1077 = shalt.err (!%p1074_p4)
}
  0x2b   :  { %s1078_s11 = scalar_lea.vmem %s48_s25, 512  ;;  %p1083_p6 = scmp.lt.s32.totalorder %s48_s25, %s48_s25 }
  0x2c   :  { %p1079_p5 = scmp.ne.s32.totalorder %s48_s25, %s1078_s11  ;;  %p1084_p7 = scmp.lt.s32.totalorder %s1078_s11, %s1078_s11 }
  0x2e   :  { %p1085_p8 = por %p1084_p7, %p1083_p6 }
  0x30   :  { %p1086_p9 = pnand %p1085_p8, %p1079_p5 }
  0x32   :  { %1089 = shalt.err (!%p1086_p9)
}
  0x33   :  { %53 = dma.hbm_to_vmem [thread:$0]  %s1325_s4, 512, %s48_s25, [#allocation7], %s1119_s7, %s1119_s7, %s1120_s8  }
  0x34   :  { %1112 = dma.done.wait [#allocation4], 6144  }
  0x35   :  { %1113 = vsyncadd [#allocation4], 4294961152 }
  0x36   :  { %1114 = dma.done.wait [#allocation7], 1536  }
  0x37   :  { %1115 = vsyncadd [#allocation7], 4294965760  ;;  %v71_v0 = vld [vmem:[#allocation3 + $0x10] sm:$0xff]  ;;  %v74_v1 = vld [vmem:[#allocation3 + $0x28] sm:$0xff]  ;;  %v1125_v34 = vmov 0   ;;  %s1127_s3 = smov 126  }
  0x38   :  { %v77_v2 = vld [vmem:[#allocation3 + $0x40] sm:$0xff]  ;;  %v947_v3 = vpack.c.bf16 %v74_v1, %v71_v0  ;;  %v80_v4 = vld [vmem:[#allocation3 + $0x58] sm:$0xff]  ;;  %v83_v6 = vld [vmem:[#allocation3 + $0x70] sm:$0xff]  ;;  %1001 = vset.pattern.permute.xlu1 %v1125_v34  ;;  %1002 = vset.pattern.permute.xlu0 %v1125_v34  ;;  %vm416_vm0 = vcmask 130048  }
  0x39   :  { %v951_v5 = vpack.c.bf16 %v80_v4, %v77_v2  ;;  %v86_v7 = vld [vmem:[#allocation3 + $0x88] sm:$0xff]  ;;  %v1210_v9 = vld [vmem:[%s1321_s0] sm:$0xff]  ;;  %v92_v11 = vld [vmem:[#allocation3 + $0xb8] sm:$0xff] }
  0x3a   :  { %948 = vmatprep.subr.bf16.mxu1 %v947_v3  ;;  %v955_v8 = vpack.c.bf16 %v86_v7, %v83_v6  ;;  %v89_v10 = vld [vmem:[#allocation3 + $0xa0] sm:$0xff]  ;;  %909 = vmatprep.mubr.f32.mxu1 %v1210_v9  ;;  %v70_v12 = vld [vmem:[#allocation3 + $0x8] sm:$0xff]  ;;  %v72_v15 = vld [vmem:[#allocation3 + $0x18] sm:$0xff] }
  0x3b   :  { %950 = vmatpush3.bf16.msra.mxu1 %v947_v3  ;;  %v73_v13 = vld [vmem:[#allocation3 + $0x20] sm:$0xff]  ;;  %v959_v18 = vpack.c.bf16 %v92_v11, %v89_v10  ;;  %v95_v19 = vld [vmem:[#allocation3 + $0xd0] sm:$0xff]  ;;  %v98_v20 = vld [vmem:[#allocation3 + $0xe8] sm:$0xff] }
  0x3c   :  { %952 = vmatprep.subr.bf16.mxu1 %v951_v5  ;;  %v69_v14 = vld [vmem:[#allocation3] sm:$0xff]  ;;  %v915_v16 = vpack.c.bf16 %v73_v13, %v70_v12  ;;  %v963_v21 = vpack.c.bf16 %v98_v20, %v95_v19  ;;  %v104_v23 = vld [vmem:[#allocation3 + $0x118] sm:$0xff]  ;;  %v107_v25 = vld [vmem:[#allocation3 + $0x130] sm:$0xff] }
  0x3d   :  { %v917_v17 = vpack.c.bf16 %v72_v15, %v69_v14  ;;  %v101_v22 = vld [vmem:[#allocation3 + $0x100] sm:$0xff]  ;;  %v110_v26 = vld [vmem:[#allocation3 + $0x148] sm:$0xff]  ;;  %v116_v29 = vld [vmem:[#allocation3 + $0x178] sm:$0xff]  ;;  %v1126_v14 = vmov 0.0   ;;  %v119_v15 = vlaneseq }
  0x3e   :  { %916 = vmatprep.subr.bf16.mxu0 %v915_v16  ;;  %v967_v24 = vpack.c.bf16 %v104_v23, %v101_v22  ;;  %v971_v27 = vpack.c.bf16 %v110_v26, %v107_v25  ;;  %v113_v28 = vld [vmem:[#allocation3 + $0x160] sm:$0xff]  ;;  %v1216_v31 = vld [vmem:[%s1321_s0 + $0x8] sm:$0xff]  ;;  %v1221_v32 = vld [vmem:[%s1321_s0 + $0x10] sm:$0xff]  ;;  %198 = vmatprep.mubr.f32.mxu0 %v1126_v14 }
  0x3f   :  { %954 = vmatpush3.bf16.msra.mxu1 %v951_v5  ;;  %918 = vmatpush1.bf16.msra.mxu0 %v917_v17  ;;  %v975_v30 = vpack.c.bf16 %v116_v29, %v113_v28  ;;  %v1228_v33 = vld [vmem:[%s1321_s0 + $0x18] sm:$0xff]  ;;  %v79_v36 = vld [vmem:[#allocation3 + $0x50] sm:$0xff]  ;;  %v78_v39 = vld [vmem:[#allocation3 + $0x48] sm:$0xff]  ;;  %v120_v16 = vshrl.u32 %v119_v15, 7 }
  0x40   :  { %956 = vmatprep.subr.bf16.mxu1 %v955_v8  ;;  %v76_v35 = vld [vmem:[#allocation3 + $0x38] sm:$0xff]  ;;  %v75_v38 = vld [vmem:[#allocation3 + $0x30] sm:$0xff]  ;;  %v82_v41 = vld [vmem:[#allocation3 + $0x68] sm:$0xff] }
  0x41   :  { %v919_v37 = vpack.c.bf16 %v79_v36, %v76_v35  ;;  %v921_v40 = vpack.c.bf16 %v78_v39, %v75_v38  ;;  %v85_v42 = vld [vmem:[#allocation3 + $0x80] sm:$0xff]  ;;  %v84_v45 = vld [vmem:[#allocation3 + $0x78] sm:$0xff]  ;;  %v91_v48 = vld [vmem:[#allocation3 + $0xb0] sm:$0xff]  ;;  %v129_v17 = vsub.s32 2, %v120_v16  ;;  %v1248_v28 = vsub.s32 0, %v120_v16 }
  0x42   :  { %v923_v43 = vpack.c.bf16 %v85_v42, %v82_v41  ;;  %v81_v44 = vld [vmem:[#allocation3 + $0x60] sm:$0xff]  ;;  %v88_v47 = vld [vmem:[#allocation3 + $0x98] sm:$0xff]  ;;  %v87_v50 = vld [vmem:[#allocation3 + $0x90] sm:$0xff]  ;;  %v1251_v35 = vsub.s32 1, %v120_v16 }
  0x43   :  { %958 = vmatpush3.bf16.msra.mxu1 %v955_v8  ;;  %920 = vmatprep.subr.bf16.mxu0 %v919_v37  ;;  %v925_v46 = vpack.c.bf16 %v84_v45, %v81_v44  ;;  %v927_v49 = vpack.c.bf16 %v91_v48, %v88_v47  ;;  %v90_v51 = vld [vmem:[#allocation3 + $0xa8] sm:$0xff]  ;;  %v97_v54 = vld [vmem:[#allocation3 + $0xe0] sm:$0xff]  ;;  %v96_v57 = vld [vmem:[#allocation3 + $0xd8] sm:$0xff] }
  0x44   :  { %960 = vmatprep.subr.bf16.mxu1 %v959_v18  ;;  %922 = vmatpush1.bf16.msra.mxu0 %v921_v40  ;;  %v929_v52 = vpack.c.bf16 %v90_v51, %v87_v50  ;;  %v94_v53 = vld [vmem:[#allocation3 + $0xc8] sm:$0xff]  ;;  %v93_v56 = vld [vmem:[#allocation3 + $0xc0] sm:$0xff]  ;;  %v100_v59 = vld [vmem:[#allocation3 + $0xf8] sm:$0xff] }
  0x45   :  { %924 = vmatprep.subr.bf16.mxu0 %v923_v43  ;;  %v931_v55 = vpack.c.bf16 %v97_v54, %v94_v53  ;;  %v933_v58 = vpack.c.bf16 %v96_v57, %v93_v56  ;;  %v103_v60 = vld [vmem:[#allocation3 + $0x110] sm:$0xff]  ;;  %v102_v63 = vld [vmem:[#allocation3 + $0x108] sm:$0xff]  ;;  %v109_v2 = vld [vmem:[#allocation3 + $0x140] sm:$0xff] }
  0x46   :  { %v935_v61 = vpack.c.bf16 %v103_v60, %v100_v59  ;;  %v99_v62 = vld [vmem:[#allocation3 + $0xf0] sm:$0xff]  ;;  %v106_v1 = vld [vmem:[#allocation3 + $0x128] sm:$0xff]  ;;  %v105_v3 = vld [vmem:[#allocation3 + $0x120] sm:$0xff] }
  0x47   :  { %962 = vmatpush3.bf16.msra.mxu1 %v959_v18  ;;  %v937_v0 = vpack.c.bf16 %v102_v63, %v99_v62  ;;  %v939_v4 = vpack.c.bf16 %v109_v2, %v106_v1  ;;  %v108_v5 = vld [vmem:[#allocation3 + $0x138] sm:$0xff]  ;;  %v115_v8 = vld [vmem:[#allocation3 + $0x170] sm:$0xff]  ;;  %v114_v12 = vld [vmem:[#allocation3 + $0x168] sm:$0xff] }
  0x48   :  { %964 = vmatprep.subr.bf16.mxu1 %v963_v21  ;;  %926 = vmatpush1.bf16.msra.mxu0 %v925_v46  ;;  %v941_v6 = vpack.c.bf16 %v108_v5, %v105_v3  ;;  %v112_v7 = vld [vmem:[#allocation3 + $0x158] sm:$0xff]  ;;  %v111_v10 = vld [vmem:[#allocation3 + $0x150] sm:$0xff] }
  0x49   :  { %928 = vmatprep.subr.bf16.mxu0 %v927_v49  ;;  %v943_v11 = vpack.c.bf16 %v115_v8, %v112_v7  ;;  %v945_v13 = vpack.c.bf16 %v114_v12, %v111_v10 }
  0x4b   :  { %966 = vmatpush3.bf16.msra.mxu1 %v963_v21 }
  0x4c   :  { %968 = vmatprep.subr.bf16.mxu1 %v967_v24  ;;  %930 = vmatpush1.bf16.msra.mxu0 %v929_v52 }
  0x4d   :  { %932 = vmatprep.subr.bf16.mxu0 %v931_v55 }
  0x4f   :  { %970 = vmatpush3.bf16.msra.mxu1 %v967_v24 }
  0x50   :  { %972 = vmatprep.subr.bf16.mxu1 %v971_v27  ;;  %934 = vmatpush1.bf16.msra.mxu0 %v933_v58 }
  0x51   :  { %936 = vmatprep.subr.bf16.mxu0 %v935_v61 }
  0x53   :  { %974 = vmatpush3.bf16.msra.mxu1 %v971_v27  ;;  %v1128_v27 = vmov 1  }
  0x54   :  { %976 = vmatprep.subr.bf16.mxu1 %v975_v30  ;;  %938 = vmatpush1.bf16.msra.mxu0 %v937_v0 }
  0x55   :  { %940 = vmatprep.subr.bf16.mxu0 %v939_v4 }
  0x57   :  { %978 = vmatpush3.bf16.msra.mxu1 %v975_v30 }
  0x58   :  { %942 = vmatpush1.bf16.msra.mxu0 %v941_v6 }
  0x59   :  { %944 = vmatprep.subr.bf16.mxu0 %v943_v11 }
  0x5a   :  { %910 = vmatmul.mubr.f32.vlgmr.msra.gmra.mrb[0].mxu1 %v1216_v31 }
  0x5b   :  { %912 = vmatprep.mubr.f32.mxu1 %v1221_v32 }
  0x5c   :  { %946 = vmatpush1.bf16.msra.mxu0 %v945_v13 }
  0x5e   :  { %913 = vmatmul.mubr.f32.gmra.mrb[2].mxu1 %v1228_v33 }
  0x5f   :  { %502 = vmatprep.mubr.f32.mxu1 %v1126_v14  ;;  %199 = vmatmul.mubr.f32.vlgmr.msra.gmra.mrb[0].mxu0 %v1210_v9  ;;  %v117_v9 = vld [vmem:[%s1323_s2] sm:$0x7] }
  0x60   :  { %204 = vmatprep.mubr.f32.mxu0 %v1126_v14  ;;  %v130_v18 = vrot.slane %v117_v9, %v129_v17  ;;  %v122_v29 = vrot.slane %v117_v9, %v1248_v28  ;;  %v126_v39 = vrot.slane %v117_v9, %v1251_v35 }
  0x63   :  { %205 = vmatmul.mubr.f32.gmra.mrb[2].mxu0 %v1216_v31 }
  0x64   :  { %210 = vmatprep.mubr.f32.mxu0 %v1126_v14 }
  0x67   :  { %211 = vmatmul.mubr.f32.gmra.mrb[4].mxu0 %v1221_v32 }
  0x68   :  { %216 = vmatprep.mubr.f32.mxu0 %v1126_v14 }
  0x6b   :  { %217 = vmatmul.mubr.f32.gmra.mrb[6].mxu0 %v1228_v33 }
  0x6c   :  { %741 = vmatprep.mubr.f32.mxu0 %v1126_v14 }
 0x12d   :  { %v911_v19 = vpop.f32.mrb[0].mxu1 }
 0x12e   :  { %v295_v20 = vadd.f32 %v911_v19, %v130_v18  ;;  %v289_v21 = vpop.f32.mrb[1].mxu1 }
 0x12f   :  { %v290_v22 = vadd.f32 %v289_v21, %v130_v18 }
 0x130   :  { %389 = vperm.xlu1 %1001, %v295_v20  }
 0x131   :  { %v914_v23 = vpop.f32.mrb[2].mxu1  ;;  %346 = vrot.lane.b32.xlu0 %v290_v22, %s1127_s3 }
 0x132   :  { %v305_v24 = vadd.f32 %v914_v23, %v130_v18  ;;  %v299_v25 = vpop.f32.mrb[3].mxu1  ;;  %v200_v30 = vpop.f32.mrb[0].mxu0 }
 0x133   :  { %v300_v26 = vadd.f32 %v299_v25, %v130_v18  ;;  %v202_v31 = vpop.f32.mrb[1].mxu0  ;;  %v201_v33 = vadd.f32 %v200_v30, %v122_v29  ;;  %v320_v18 = vld [vmem:[%s1326_s5] sm:$0xff] }
 0x134   :  { %597 = vrot.lane.b32.xlu1 %v305_v24, %s1127_s3 }
 0x135   :  { %348 = vrot.lane.b32.xlu0 %v295_v20, %s1127_s3  ;;  %1003 = vset.pattern.permute.xlu1 %v1128_v27 }
 0x136   :  { %v206_v36 = vpop.f32.mrb[2].mxu0 }
 0x137   :  { %v207_v37 = vadd.f32 %v206_v36, %v122_v29  ;;  %v208_v41 = vpop.f32.mrb[3].mxu0 }
 0x138   :  { %595 = vrot.lane.b32.xlu1 %v300_v26, %s1127_s3  ;;  %v209_v42 = vadd.f32 %v208_v41, %v126_v39  ;;  %v323_v41 = vld [vmem:[#allocation6] sm:$0xff] }
 0x139   :  { %385 = vperm.xlu0 %1002, %v290_v22   ;;  %v981_v40 = vpack.c.bf16 %v207_v37, %v201_v33 }
 0x13a   :  { %v212_v43 = vpop.f32.mrb[4].mxu0 }
 0x13b   :  { %v213_v44 = vadd.f32 %v212_v43, %v122_v29  ;;  %v214_v45 = vpop.f32.mrb[5].mxu0 }
 0x13c   :  { %401 = vperm.xlu1 %1003, %v290_v22   ;;  %v215_v48 = vadd.f32 %v214_v45, %v126_v39  ;;  %v322_v22 = vld [vmem:[%s1326_s5 + $0x10] sm:$0xff]  ;;  %v324_v45 = vld [vmem:[#allocation6 + $0x8] sm:$0xff] }
 0x13d   :  { %1004 = vset.pattern.permute.xlu0 %v1128_v27 }
 0x13e   :  { %405 = vperm.xlu0 %1004, %v295_v20   ;;  %v218_v49 = vpop.f32.mrb[6].mxu0  ;;  %v321_v20 = vld [vmem:[%s1326_s5 + $0x8] sm:$0xff]  ;;  %s1129_s5 = smov [#allocation9]  }
 0x13f   :  { %v219_v50 = vadd.f32 %v218_v49, %v122_v29  ;;  %v220_v51 = vpop.f32.mrb[7].mxu0  ;;  %s828_s26 = sshll.u32 %s1129_s5, 4  ;;  %s829_s26 = int_to_ptr.vmem [resolvable:$true] %s828_s26 }
 0x140   :  { %1005 = vset.pattern.permute.xlu1 %v1125_v34  ;;  %v221_v52 = vadd.f32 %v220_v51, %v126_v39  ;;  %v325_v51 = vld [vmem:[#allocation6 + $0x10] sm:$0xff]  ;;  %s1090_s27 = scalar_lea.vmem %s829_s26, 1024  ;;  %p1095_p11 = scmp.lt.s32.totalorder %s829_s26, %s829_s26 }
 0x141   :  { %638 = vperm.xlu1 %1005, %v305_v24   ;;  %v985_v53 = vpack.c.bf16 %v219_v50, %v213_v44  ;;  %p1091_p10 = scmp.ne.s32.totalorder %s829_s26, %s1090_s27  ;;  %p1096_p12 = scmp.lt.s32.totalorder %s1090_s27, %s1090_s27 }
 0x142   :  { %650 = vperm.xlu0 %1004, %v300_v26   ;;  %v983_v55 = vpack.c.bf16 %v221_v52, %v215_v48  ;;  %v334_v48 = vld [vmem:[#allocation8 + $0x18] sm:$0xff] }
 0x143   :  { %p1097_p13 = por %p1096_p12, %p1095_p11 }
 0x144   :  { %984 = vmatprep.subr.bf16.mxu0 %v983_v55 }
 0x145   :  { %1006 = vset.pattern.permute.xlu1 %v1128_v27  ;;  %986 = vmatpush1.bf16.msra.mxu0 %v985_v53  ;;  %p1098_p0 = pnand %p1097_p13, %p1091_p10 }
 0x146   :  { %654 = vperm.xlu1 %1006, %v305_v24  }
 0x14a   :  { %1007 = vset.pattern.permute.xlu1 %v1125_v34  ;;  %v203_v34 = vadd.f32 %v202_v31, %v126_v39 }
 0x14b   :  { %634 = vperm.xlu1 %1007, %v300_v26  }
 0x14c   :  { %v979_v47 = vpack.c.bf16 %v209_v42, %v203_v34  ;;  %v331_v42 = vld [vmem:[#allocation8] sm:$0xff] }
 0x14e   :  { %980 = vmatprep.subr.bf16.mxu1 %v979_v47  ;;  %v332_v47 = vld [vmem:[#allocation8 + $0x8] sm:$0xff] }
 0x14f   :  { %982 = vmatpush1.bf16.msra.mxu1 %v981_v40 }
 0x150   :  { %987 = vmatprep.subr.bf16.mxu1 %v983_v55 }
 0x1a3   :  { %v347_v32 = vpop.permute.xlu0 %346 }
 0x1a4   :  { %352 = vxpose.xlu0.b32.start [1/2] (short) (narrow) %v347_v32, 8 }
 0x1a7   :  { %v349_v38 = vpop.permute.xlu0 %348 }
 0x1a8   :  { %353 = vxpose.xlu0.b32.end [2/2] (short) (narrow) %v349_v38, 8 }
 0x1af   :  { %v390_v46 = vpop.permute.xlu1 %389 }
 0x1b3   :  { %v598_v54 = vpop.permute.xlu1 %597 }
 0x1b7   :  { %v596_v56 = vpop.permute.xlu1 %595 }
 0x1b8   :  { %601 = vxpose.xlu1.b32.start [1/2] (short) (narrow) %v596_v56, 8  ;;  %v386_v57 = vpop.permute.xlu0 %385 }
 0x1bb   :  { %v402_v60 = vpop.permute.xlu1 %401 }
 0x1bc   :  { %602 = vxpose.xlu1.b32.end [2/2] (short) (narrow) %v598_v54, 8 }
 0x1bd   :  { %v406_v58 = vpop.permute.xlu0 %405 }
 0x1c0   :  { %v639_v0 = vpop.permute.xlu1 %638 }
 0x1c1   :  { %v651_v59 = vpop.permute.xlu0 %650 }
 0x1c5   :  { %v655_v4 = vpop.permute.xlu1 %654 }
 0x1ca   :  { %v635_v7 = vpop.permute.xlu1 %634 }
 0x224   :  { %v368_v61 = vpop.trf.xlu0 }
 0x225   :  { %v395_v62 = vrot.slane %v368_v61, %v1248_v28  ;;  %v411_v2 = vrot.slane %v368_v61, %v1251_v35 }
 0x227   :  { %v396_v63 = vsub.f32 %v386_v57, %v395_v62  ;;  %v397_v1 = vsub.f32 %v390_v46, %v395_v62  ;;  %v412_v3 = vsub.f32 %v402_v60, %v411_v2  ;;  %v413_v5 = vsub.f32 %v406_v58, %v411_v2  ;;  %v327_v58 = vld [vmem:[#allocation6 + $0x20] sm:$0xff]  ;;  %v330_v2 = vld [vmem:[#allocation6 + $0x38] sm:$0xff] }
 0x229   :  { %1008 = vtanh.f32 %v396_v63 }
 0x22a   :  { %1010 = vtanh.f32 %v397_v1  ;;  %v328_v1 = vld [vmem:[#allocation6 + $0x28] sm:$0xff] }
 0x22b   :  { %1012 = vtanh.f32 %v412_v3 }
 0x22c   :  { %1014 = vtanh.f32 %v413_v5 }
 0x233   :  { %v1009_v6 = vpop.eup %1008 }
 0x234   :  { %843 = vmatmul.mubr.msk.f32.vlgmr.msra.gmra.mrb[4].mxu1 %vm416_vm0, %v1009_v6  ;;  %v1011_v8 = vpop.eup %1010 }
 0x235   :  { %988 = vmatpush1.bf16.msra.mxu1 %v985_v53  ;;  %508 = vmatprep.mubr.f32.mxu1 %v1126_v14  ;;  %v1013_v12 = vpop.eup %1012  ;;  %v326_v53 = vld [vmem:[#allocation6 + $0x18] sm:$0xff] }
 0x236   :  { %v1015_v17 = vpop.eup %1014 }
 0x238   :  { %v617_v10 = vpop.trf.xlu1  ;;  %844 = vmatmul.mubr.msk.f32.gmra.mrb[6].mxu1 %vm416_vm0, %v1011_v8 }
 0x239   :  { %v644_v11 = vrot.slane %v617_v10, %v1248_v28  ;;  %514 = vmatprep.mubr.f32.mxu1 %v1126_v14  ;;  %v660_v16 = vrot.slane %v617_v10, %v1251_v35 }
 0x23b   :  { %v645_v13 = vsub.f32 %v635_v7, %v644_v11  ;;  %v646_v15 = vsub.f32 %v639_v0, %v644_v11  ;;  %v661_v9 = vsub.f32 %v651_v59, %v660_v16  ;;  %v662_v19 = vsub.f32 %v655_v4, %v660_v16  ;;  %v329_v59 = vld [vmem:[#allocation6 + $0x30] sm:$0xff] }
 0x23c   :  { %845 = vmatmul.mubr.msk.f32.gmra.mrb[8].mxu1 %vm416_vm0, %v1013_v12 }
 0x23d   :  { %1016 = vtanh.f32 %v645_v13  ;;  %520 = vmatprep.mubr.f32.mxu1 %v1126_v14 }
 0x23e   :  { %1018 = vtanh.f32 %v646_v15 }
 0x23f   :  { %1020 = vtanh.f32 %v661_v9 }
 0x240   :  { %846 = vmatmul.mubr.msk.f32.gmra.mrb[10].mxu1 %vm416_vm0, %v1015_v17  ;;  %1022 = vtanh.f32 %v662_v19 }
 0x241   :  { %526 = vmatprep.mubr.f32.mxu1 %v1126_v14 }
 0x244   :  { %847 = vmatmul.mubr.msk.f32.gmra.mrb[12].mxu1 %vm416_vm0, %v320_v18 }
 0x245   :  { %532 = vmatprep.mubr.f32.mxu1 %v1126_v14 }
 0x247   :  { %v1017_v21 = vpop.eup %1016 }
 0x248   :  { %848 = vmatmul.mubr.msk.f32.gmra.mrb[14].mxu1 %vm416_vm0, %v321_v20  ;;  %850 = vmatmul.mubr.msk.f32.vlgmr.msra.gmra.mrb[8].mxu0 %vm416_vm0, %v1017_v21  ;;  %v1019_v23 = vpop.eup %1018 }
 0x249   :  { %538 = vmatprep.mubr.f32.mxu1 %v1126_v14  ;;  %747 = vmatprep.mubr.f32.mxu0 %v1126_v14  ;;  %v1021_v24 = vpop.eup %1020 }
 0x24a   :  { %v1023_v25 = vpop.eup %1022 }
 0x24c   :  { %849 = vmatmul.mubr.msk.f32.gmra.mrb[16].mxu1 %vm416_vm0, %v322_v22  ;;  %851 = vmatmul.mubr.msk.f32.gmra.mrb[10].mxu0 %vm416_vm0, %v1019_v23 }
 0x24d   :  { %753 = vmatprep.mubr.f32.mxu0 %v1126_v14  ;;  %777 = vmatprep.mubr.f32.mxu1 %v1126_v14 }
 0x250   :  { %852 = vmatmul.mubr.msk.f32.gmra.mrb[12].mxu0 %vm416_vm0, %v1021_v24  ;;  %856 = vmatmul.mubr.msk.f32.vlgmr.msra.gmra.mrb[18].mxu1 %vm416_vm0, %v322_v22 }
 0x251   :  { %759 = vmatprep.mubr.f32.mxu0 %v1126_v14 }
 0x254   :  { %853 = vmatmul.mubr.msk.f32.gmra.mrb[14].mxu0 %vm416_vm0, %v1023_v25 }
 0x255   :  { %765 = vmatprep.mubr.f32.mxu0 %v1126_v14 }
 0x258   :  { %854 = vmatmul.mubr.msk.f32.gmra.mrb[16].mxu0 %vm416_vm0, %v320_v18 }
 0x259   :  { %771 = vmatprep.mubr.f32.mxu0 %v1126_v14  ;;  %v333_v14 = vld [vmem:[#allocation8 + $0x10] sm:$0xff] }
 0x25c   :  { %855 = vmatmul.mubr.msk.f32.gmra.mrb[18].mxu0 %vm416_vm0, %v321_v20 }
 0x307   :  { %v504_v26 = vpop.f32.mrb[4].mxu1 }
 0x308   :  { %v506_v27 = vpop.f32.mrb[5].mxu1  ;;  %v561_v56 = vmul.f32 %v504_v26, %v323_v41 }
 0x309   :  { %v562_v57 = vmul.f32 %v506_v27, %v324_v45 }
 0x30b   :  { %v510_v29 = vpop.f32.mrb[6].mxu1 }
 0x30c   :  { %v512_v30 = vpop.f32.mrb[7].mxu1  ;;  %v563_v0 = vmul.f32 %v510_v29, %v325_v51 }
 0x30d   :  { %v564_v8 = vmul.f32 %v512_v30, %v326_v53 }
 0x30f   :  { %v516_v31 = vpop.f32.mrb[8].mxu1 }
 0x310   :  { %v518_v32 = vpop.f32.mrb[9].mxu1  ;;  %v565_v13 = vmul.f32 %v516_v31, %v327_v58 }
 0x311   :  { %v566_v9 = vmul.f32 %v518_v32, %v328_v1 }
 0x313   :  { %v522_v33 = vpop.f32.mrb[10].mxu1 }
 0x314   :  { %v524_v35 = vpop.f32.mrb[11].mxu1  ;;  %v567_v15 = vmul.f32 %v522_v33, %v329_v59 }
 0x315   :  { %v568_v18 = vmul.f32 %v524_v35, %v330_v2 }
 0x317   :  { %v528_v36 = vpop.f32.mrb[12].mxu1 }
 0x318   :  { %v530_v37 = vpop.f32.mrb[13].mxu1 }
 0x31b   :  { %v743_v38 = vpop.f32.mrb[8].mxu0  ;;  %v534_v39 = vpop.f32.mrb[14].mxu1 }
 0x31c   :  { %v1293_v40 = vpop.f32.mrb[9].mxu0  ;;  %v536_v34 = vpop.f32.mrb[15].mxu1  ;;  %v800_v30 = vmul.f32 %v743_v38, %v323_v41 }
 0x31d   :  { %v801_v35 = vmul.f32 %v1293_v40, %v324_v45 }
 0x31f   :  { %v540_v43 = vpop.f32.mrb[16].mxu1  ;;  %v1295_v44 = vpop.f32.mrb[10].mxu0 }
 0x320   :  { %v548_v46 = vrot.slane %v540_v43, %v1248_v28  ;;  %v542_v49 = vpop.f32.mrb[17].mxu1  ;;  %v1298_v50 = vpop.f32.mrb[11].mxu0 }
 0x321   :  { %v552_v52 = vrot.slane %v542_v49, %v1248_v28 }
 0x322   :  { %v553_v54 = vmul.f32 %v548_v46, %v331_v42  ;;  %v555_v55 = vmul.f32 %v548_v46, %v333_v14 }
 0x323   :  { %v554_v60 = vmul.f32 %v552_v52, %v332_v47  ;;  %v556_v61 = vmul.f32 %v552_v52, %v334_v48  ;;  %v755_v62 = vpop.f32.mrb[12].mxu0  ;;  %v779_v63 = vpop.f32.mrb[18].mxu1 }
 0x324   :  { %v557_v3 = vadd.f32 %v553_v54, %v528_v36  ;;  %v559_v4 = vadd.f32 %v555_v55, %v534_v39  ;;  %v757_v5 = vpop.f32.mrb[13].mxu0  ;;  %v787_v6 = vrot.slane %v779_v63, %v1248_v28  ;;  %v781_v7 = vpop.f32.mrb[19].mxu1  ;;  %v804_v39 = vmul.f32 %v755_v62, %v327_v58 }
 0x325   :  { %v558_v10 = vadd.f32 %v554_v60, %v530_v37  ;;  %v560_v11 = vadd.f32 %v556_v61, %v536_v34  ;;  %v791_v12 = vrot.slane %v781_v7, %v1248_v28  ;;  %v805_v43 = vmul.f32 %v757_v5, %v328_v1 }
 0x326   :  { %v569_v16 = vadd.f32 %v561_v56, %v557_v3  ;;  %v571_v17 = vadd.f32 %v563_v0, %v559_v4  ;;  %v792_v25 = vmul.f32 %v787_v6, %v331_v42  ;;  %v794_v32 = vmul.f32 %v787_v6, %v333_v14 }
 0x327   :  { %v570_v19 = vadd.f32 %v562_v57, %v558_v10  ;;  %v572_v20 = vadd.f32 %v564_v8, %v560_v11  ;;  %v761_v21 = vpop.f32.mrb[14].mxu0  ;;  %v793_v29 = vmul.f32 %v791_v12, %v332_v47  ;;  %v795_v37 = vmul.f32 %v791_v12, %v334_v48 }
 0x328   :  { %v573_v22 = vadd.f32 %v569_v16, %v565_v13  ;;  %v575_v23 = vadd.f32 %v571_v17, %v567_v15  ;;  %v763_v24 = vpop.f32.mrb[15].mxu0  ;;  %v802_v47 = vmul.f32 %v1295_v44, %v325_v51  ;;  %v803_v55 = vmul.f32 %v1298_v50, %v326_v53 }
 0x329   :  { %v574_v26 = vadd.f32 %v570_v19, %v566_v9  ;;  %v576_v27 = vadd.f32 %v572_v20, %v568_v18  ;;  %v806_v56 = vmul.f32 %v761_v21, %v329_v59  ;;  %v807_v40 = vmul.f32 %v763_v24, %v330_v2 }
 0x32a   :  { %580 = vst [vmem:[#allocation9] sm:$0xff] %v573_v22  ;;  %582 = vst [vmem:[#allocation9 + $0x10] sm:$0xff] %v575_v23 }
 0x32b   :  { %581 = vst [vmem:[#allocation9 + $0x8] sm:$0xff] %v574_v26  ;;  %583 = vst [vmem:[#allocation9 + $0x18] sm:$0xff] %v576_v27  ;;  %v767_v28 = vpop.f32.mrb[16].mxu0 }
 0x32c   :  { %v796_v31 = vadd.f32 %v792_v25, %v767_v28  ;;  %v769_v33 = vpop.f32.mrb[17].mxu0 }
 0x32d   :  { %v797_v36 = vadd.f32 %v793_v29, %v769_v33 }
 0x32e   :  { %v808_v34 = vadd.f32 %v800_v30, %v796_v31 }
 0x32f   :  { %v809_v42 = vadd.f32 %v801_v35, %v797_v36  ;;  %v773_v46 = vpop.f32.mrb[18].mxu0 }
 0x330   :  { %v812_v49 = vadd.f32 %v808_v34, %v804_v39  ;;  %v798_v52 = vadd.f32 %v794_v32, %v773_v46  ;;  %v775_v54 = vpop.f32.mrb[19].mxu0 }
 0x331   :  { %v813_v38 = vadd.f32 %v809_v42, %v805_v43  ;;  %v799_v41 = vadd.f32 %v795_v37, %v775_v54 }
 0x332   :  { %819 = vst [vmem:[#allocation9 + $0x20] sm:$0xff] %v812_v49  ;;  %v810_v14 = vadd.f32 %v802_v47, %v798_v52 }
 0x333   :  { %820 = vst [vmem:[#allocation9 + $0x28] sm:$0xff] %v813_v38  ;;  %v811_v45 = vadd.f32 %v803_v55, %v799_v41 }
 0x334   :  { %v814_v48 = vadd.f32 %v810_v14, %v806_v56 }
 0x335   :  { %v815_v57 = vadd.f32 %v811_v45, %v807_v40 }
 0x336   :  { %821 = vst [vmem:[#allocation9 + $0x30] sm:$0xff] %v814_v48 }
 0x337   :  { %822 = vst [vmem:[#allocation9 + $0x38] sm:$0xff] %v815_v57 }
 0x338   :  { %1101 = shalt.err (!%p1098_p0)
}
 0x339   :  { %s1102_s30 = scalar_lea.hbm %s1327_s6, 1024 }
 0x33a   :  { %p1103_p1 = scmp.ne.s32.totalorder %s1327_s6, %s1102_s30  ;;  %p1106_p2 = scmp.lt.u32.totalorder %s1102_s30, %s1327_s6 }
 0x33c   :  { %p1108_p3 = pnand %p1106_p2, %p1103_p1 }
 0x33e   :  { %1111 = shalt.err (!%p1108_p3)
}
 0x33f   :  { %834 = dma.vmem_to_hbm [thread:$0]  %s829_s26, 1024, %s1327_s6, [#allocation5], %s1119_s7, %s1119_s7, %s1120_s8  }
 0x340   :  { %1116 = dma.done.wait [#allocation5], 1024  }
 0x341   :  { %1117 = vsyncadd [#allocation5], 4294966272 }
 0x342   :  { %838 = vsyncpa [#allocation4], 1 }
 0x343   :  { %839 = vsyncpa [#allocation7], 1 }
 0x344   :  { %840 = vsyncpa [#allocation5], 1 }

</bundles_post_ra>
